<compile_context>
chip_gen: v5e
topology: v5e:2x2
jax: 0.10.0
libtpu: 0.0.40
codegen_flags: <defaults>
</compile_context>

<pallas_src>
import jax
import jax.numpy as jnp
from jax.experimental import pallas as pl
from jax.experimental.pallas import tpu as pltpu


def _lstm_cell_kernel(xc_ref, s_ref, w_ref, b_ref, a_ref, c_ref,
                      s_out_ref, h_out_ref):
    # xc: (B, I+H)   s_prev: (B, H)
    # w:  (I+H, 4H)  b/a/c: (1, 4H)
    # outputs: s_out, h_out each (B, H)
    hidden = s_ref.shape[-1]

    # One fused, lane-dense gate pre-activation: (B, 4H), single MXU matmul.
    gates = (jnp.dot(xc_ref[...], w_ref[...],
                     preferred_element_type=jnp.float32)
             + b_ref[...])

    # Single full-width transcendental pass over all four gates.
    # Gate g (tanh):      a=1,   c=0   (weights unscaled)
    # Gates i/f/o (sigm): a=0.5, c=0.5 (weights/bias pre-scaled by 0.5, since
    #                                   sigmoid(x) = 0.5*tanh(0.5*x) + 0.5)
    t = jnp.tanh(gates)
    act = a_ref[...] * t + c_ref[...]

    g = act[:, 0 * hidden:1 * hidden]
    i = act[:, 1 * hidden:2 * hidden]
    f = act[:, 2 * hidden:3 * hidden]
    o = act[:, 3 * hidden:4 * hidden]

    s = g * i + s_ref[...] * f
    h = jnp.tanh(s) * o

    # Two separate outputs; 32-lane stores are masked vst regardless, so no
    # cross-lane concat is needed.
    s_out_ref[...] = s.astype(s_out_ref.dtype)
    h_out_ref[...] = h.astype(h_out_ref.dtype)


def lstm_cell(x, wg, wi, wf, wo, bg, bi, bf, bo, s_prev=None, h_prev=None):
    """Pallas equivalent of Lstmcell.forward.

    x:       (B, 1, input_size)
    s_prev:  (B, 1, hidden_size) or None
    h_prev:  (B, 1, hidden_size) or None
    returns: (s, h) each (B, 1, hidden_size)
    """
    B = x.shape[0]
    input_size = x.shape[2]
    hidden_size = wg.shape[1]
    concat_len = wg.shape[0]
    assert input_size == concat_len - hidden_size, (
        "input expect size:{},but get size:{}!!".format(
            concat_len - hidden_size, input_size))

    if s_prev is None:
        s_prev = jnp.zeros((B, 1, hidden_size), dtype=jnp.float32)
    if h_prev is None:
        h_prev = jnp.zeros((B, 1, hidden_size), dtype=jnp.float32)

    # Fuse the four gate weights into one (I+H, 4H) matrix; pre-scale the
    # sigmoid gates (i/f/o) by 0.5 so the kernel needs only one full-width
    # tanh + lane-constant affine.  (Done once per call; would be hoisted out
    # entirely in a looped variant.)
    w_fused = jnp.concatenate([wg, 0.5 * wi, 0.5 * wf, 0.5 * wo], axis=1)
    b_fused = jnp.concatenate([bg, 0.5 * bi, 0.5 * bf, 0.5 * bo]
                              ).reshape(1, 4 * hidden_size).astype(jnp.float32)
    aff_a = jnp.concatenate(
        [jnp.ones((hidden_size,), jnp.float32),
         jnp.full((3 * hidden_size,), 0.5, jnp.float32)]
    ).reshape(1, 4 * hidden_size)
    aff_c = jnp.concatenate(
        [jnp.zeros((hidden_size,), jnp.float32),
         jnp.full((3 * hidden_size,), 0.5, jnp.float32)]
    ).reshape(1, 4 * hidden_size)

    # Single (B, I+H) activation -> one K=(I+H) matmul in the kernel.
    xc = jnp.concatenate(
        [x.reshape(B, input_size), h_prev.reshape(B, hidden_size)], axis=-1)
    s2 = s_prev.reshape(B, hidden_size)

    # Single grid step: at this size (B=64, H=32) the kernel is latency-bound;
    # extra grid steps only add per-step overhead on 1-TC chips and don't pay
    # for cross-TC sharding on v7x.
    # TODO(synk): if batch/hidden grows, shard across v7x's 2 TCs with explicit
    # core-parallel semantics (pltpu.CORE_PARALLEL / pl.core_map).
    s_out, h_out = pl.pallas_call(
        _lstm_cell_kernel,
        out_shape=(jax.ShapeDtypeStruct((B, hidden_size), jnp.float32),
                   jax.ShapeDtypeStruct((B, hidden_size), jnp.float32)),
        grid_spec=pltpu.PrefetchScalarGridSpec(
            num_scalar_prefetch=0,
            grid=(1,),
            in_specs=[
                pl.BlockSpec((B, concat_len), lambda i: (0, 0)),
                pl.BlockSpec((B, hidden_size), lambda i: (0, 0)),
                pl.BlockSpec((concat_len, 4 * hidden_size), lambda i: (0, 0)),
                pl.BlockSpec((1, 4 * hidden_size), lambda i: (0, 0)),
                pl.BlockSpec((1, 4 * hidden_size), lambda i: (0, 0)),
                pl.BlockSpec((1, 4 * hidden_size), lambda i: (0, 0)),
            ],
            out_specs=(pl.BlockSpec((B, hidden_size), lambda i: (0, 0)),
                       pl.BlockSpec((B, hidden_size), lambda i: (0, 0))),
        ),
        compiler_params=pltpu.CompilerParams(
            dimension_semantics=("arbitrary",)),
    )(xc, s2, w_fused, b_fused, aff_a, aff_c)

    return (s_out.reshape(B, 1, hidden_size),
            h_out.reshape(B, 1, hidden_size))


def init_lstm_params(key, input_size, hidden_size):
    """Deterministic xavier_uniform weights, zero biases (matches init_weights)."""
    concat_len = input_size + hidden_size
    bound = (6.0 / (concat_len + hidden_size)) ** 0.5
    kg, ki, kf, ko = jax.random.split(key, 4)
    shape = (concat_len, hidden_size)
    wg = jax.random.uniform(kg, shape, jnp.float32, -bound, bound)
    wi = jax.random.uniform(ki, shape, jnp.float32, -bound, bound)
    wf = jax.random.uniform(kf, shape, jnp.float32, -bound, bound)
    wo = jax.random.uniform(ko, shape, jnp.float32, -bound, bound)
    bg = jnp.zeros((hidden_size,), jnp.float32)
    bi = jnp.zeros((hidden_size,), jnp.float32)
    bf = jnp.zeros((hidden_size,), jnp.float32)
    bo = jnp.zeros((hidden_size,), jnp.float32)
    return wg, wi, wf, wo, bg, bi, bf, bo


def _reference(x, wg, wi, wf, wo, bg, bi, bf, bo, s_prev, h_prev):
    xc = jnp.concatenate([x, h_prev], axis=2)
    g = jnp.tanh(jnp.matmul(xc, wg) + bg)
    i = jax.nn.sigmoid(jnp.matmul(xc, wi) + bi)
    f = jax.nn.sigmoid(jnp.matmul(xc, wf) + bf)
    o = jax.nn.sigmoid(jnp.matmul(xc, wo) + bo)
    s = g * i + s_prev * f
    h = jnp.tanh(s) * o
    return s, h


if __name__ == "__main__":
    batch = 64          # matches module's self.batch_size
    input_size = 16
    hidden_size = 32

    key = jax.random.PRNGKey(0)
    kparam, kx, ks, kh = jax.random.split(key, 4)

    params = init_lstm_params(kparam, input_size, hidden_size)
    wg, wi, wf, wo, bg, bi, bf, bo = params

    x = jax.random.normal(kx, (batch, 1, input_size), jnp.float32)
    s_prev = jax.random.normal(ks, (batch, 1, hidden_size), jnp.float32)
    h_prev = jax.random.normal(kh, (batch, 1, hidden_size), jnp.float32)

    s, h = lstm_cell(x, wg, wi, wf, wo, bg, bi, bf, bo, s_prev, h_prev)
    jax.block_until_ready((s, h))

    s_ref, h_ref = _reference(x, wg, wi, wf, wo, bg, bi, bf, bo, s_prev, h_prev)
    assert s.shape == (batch, 1, hidden_size) and h.shape == (batch, 1, hidden_size)
    assert jnp.allclose(s, s_ref, atol=1e-4, rtol=1e-4), float(jnp.abs(s - s_ref).max())
    assert jnp.allclose(h, h_ref, atol=1e-4, rtol=1e-4), float(jnp.abs(h - h_ref).max())

    print("KERNEL_OK")
</pallas_src>

<mosaic_0001>
module attributes {stable_mosaic.version = 11 : i64} {
  func.func @_lstm_cell_kernel(%arg0: i32, %arg1: memref<64x48xf32, #tpu.memory_space<vmem>>, %arg2: memref<64x32xf32, #tpu.memory_space<vmem>>, %arg3: memref<48x128xf32, #tpu.memory_space<vmem>>, %arg4: memref<1x128xf32, #tpu.memory_space<vmem>>, %arg5: memref<1x128xf32, #tpu.memory_space<vmem>>, %arg6: memref<1x128xf32, #tpu.memory_space<vmem>>, %arg7: memref<64x32xf32, #tpu.memory_space<vmem>>, %arg8: memref<64x32xf32, #tpu.memory_space<vmem>>) attributes {dimension_semantics = [#tpu.dimension_semantics<arbitrary>], iteration_bounds = array<i64: 1>, scalar_prefetch = 0 : i64, scratch_operands = 0 : i64, tpu.core_type = #tpu.core_type<tc>, window_params = [{pipeline_mode = #tpu.pipeline_mode<synchronous>, transform_indices = @transform_0, window_bounds = array<i64: 64, 48>}, {pipeline_mode = #tpu.pipeline_mode<synchronous>, transform_indices = @transform_1, window_bounds = array<i64: 64, 32>}, {pipeline_mode = #tpu.pipeline_mode<synchronous>, transform_indices = @transform_2, window_bounds = array<i64: 48, 128>}, {pipeline_mode = #tpu.pipeline_mode<synchronous>, transform_indices = @transform_3, window_bounds = array<i64: 1, 128>}, {pipeline_mode = #tpu.pipeline_mode<synchronous>, transform_indices = @transform_4, window_bounds = array<i64: 1, 128>}, {pipeline_mode = #tpu.pipeline_mode<synchronous>, transform_indices = @transform_5, window_bounds = array<i64: 1, 128>}, {pipeline_mode = #tpu.pipeline_mode<synchronous>, transform_indices = @transform_6, window_bounds = array<i64: 64, 32>}, {pipeline_mode = #tpu.pipeline_mode<synchronous>, transform_indices = @transform_7, window_bounds = array<i64: 64, 32>}]} {
    %c0 = arith.constant 0 : index
    %c0_0 = arith.constant 0 : index
    %0 = vector.load %arg1[%c0, %c0_0] : memref<64x48xf32, #tpu.memory_space<vmem>>, vector<64x48xf32>
    %c0_1 = arith.constant 0 : index
    %c0_2 = arith.constant 0 : index
    %1 = vector.load %arg3[%c0_1, %c0_2] : memref<48x128xf32, #tpu.memory_space<vmem>>, vector<48x128xf32>
    %cst = arith.constant dense<0.000000e+00> : vector<64x128xf32>
    %2 = tpu.matmul %0, %1, %cst {dimension_numbers = #tpu.dot_dimension_numbers<[1], [0], [0], [1], [0, 0, 1, 1], [], []>} : vector<64x48xf32>, vector<48x128xf32>, vector<64x128xf32> -> vector<64x128xf32>
    %c0_3 = arith.constant 0 : index
    %c0_4 = arith.constant 0 : index
    %3 = vector.load %arg4[%c0_3, %c0_4] : memref<1x128xf32, #tpu.memory_space<vmem>>, vector<1x128xf32>
    %4 = vector.broadcast %3 : vector<1x128xf32> to vector<64x128xf32>
    %5 = arith.addf %2, %4 : vector<64x128xf32>
    %6 = math.tanh %5 : vector<64x128xf32>
    %c0_5 = arith.constant 0 : index
    %c0_6 = arith.constant 0 : index
    %7 = vector.load %arg5[%c0_5, %c0_6] : memref<1x128xf32, #tpu.memory_space<vmem>>, vector<1x128xf32>
    %8 = vector.broadcast %7 : vector<1x128xf32> to vector<64x128xf32>
    %9 = arith.mulf %8, %6 : vector<64x128xf32>
    %c0_7 = arith.constant 0 : index
    %c0_8 = arith.constant 0 : index
    %10 = vector.load %arg6[%c0_7, %c0_8] : memref<1x128xf32, #tpu.memory_space<vmem>>, vector<1x128xf32>
    %11 = vector.broadcast %10 : vector<1x128xf32> to vector<64x128xf32>
    %12 = arith.addf %9, %11 : vector<64x128xf32>
    %13 = vector.extract_strided_slice %12 {offsets = [0, 0], sizes = [64, 32], strides = [1, 1]} : vector<64x128xf32> to vector<64x32xf32>
    %14 = vector.extract_strided_slice %12 {offsets = [0, 32], sizes = [64, 32], strides = [1, 1]} : vector<64x128xf32> to vector<64x32xf32>
    %15 = vector.extract_strided_slice %12 {offsets = [0, 64], sizes = [64, 32], strides = [1, 1]} : vector<64x128xf32> to vector<64x32xf32>
    %16 = vector.extract_strided_slice %12 {offsets = [0, 96], sizes = [64, 32], strides = [1, 1]} : vector<64x128xf32> to vector<64x32xf32>
    %17 = arith.mulf %13, %14 : vector<64x32xf32>
    %c0_9 = arith.constant 0 : index
    %c0_10 = arith.constant 0 : index
    %18 = vector.load %arg2[%c0_9, %c0_10] : memref<64x32xf32, #tpu.memory_space<vmem>>, vector<64x32xf32>
    %19 = arith.mulf %18, %15 : vector<64x32xf32>
    %20 = arith.addf %17, %19 : vector<64x32xf32>
    %21 = math.tanh %20 : vector<64x32xf32>
    %22 = arith.mulf %21, %16 : vector<64x32xf32>
    %c0_11 = arith.constant 0 : index
    %c0_12 = arith.constant 0 : index
    %23 = vector.load %arg7[%c0_11, %c0_12] : memref<64x32xf32, #tpu.memory_space<vmem>>, vector<64x32xf32>
    tpu.vector_store %arg7[%c0_11, %c0_12], %20 {strides = array<i32>} : memref<64x32xf32, #tpu.memory_space<vmem>>, vector<64x32xf32>,
    %c0_13 = arith.constant 0 : index
    %c0_14 = arith.constant 0 : index
    %24 = vector.load %arg8[%c0_13, %c0_14] : memref<64x32xf32, #tpu.memory_space<vmem>>, vector<64x32xf32>
    tpu.vector_store %arg8[%c0_13, %c0_14], %22 {strides = array<i32>} : memref<64x32xf32, #tpu.memory_space<vmem>>, vector<64x32xf32>,
    return
  }
  func.func @transform_0(%arg0: i32) -> (i32, i32) {
    %c0_i32 = arith.constant 0 : i32
    %c0_i32_0 = arith.constant 0 : i32
    %c0_i32_1 = arith.constant 0 : i32
    return %c0_i32, %c0_i32_0 : i32, i32
  }
  func.func @transform_1(%arg0: i32) -> (i32, i32) {
    %c0_i32 = arith.constant 0 : i32
    %c0_i32_0 = arith.constant 0 : i32
    %c0_i32_1 = arith.constant 0 : i32
    return %c0_i32, %c0_i32_0 : i32, i32
  }
  func.func @transform_2(%arg0: i32) -> (i32, i32) {
    %c0_i32 = arith.constant 0 : i32
    %c0_i32_0 = arith.constant 0 : i32
    %c0_i32_1 = arith.constant 0 : i32
    return %c0_i32, %c0_i32_0 : i32, i32
  }
  func.func @transform_3(%arg0: i32) -> (i32, i32) {
    %c0_i32 = arith.constant 0 : i32
    %c0_i32_0 = arith.constant 0 : i32
    %c0_i32_1 = arith.constant 0 : i32
    return %c0_i32, %c0_i32_0 : i32, i32
  }
  func.func @transform_4(%arg0: i32) -> (i32, i32) {
    %c0_i32 = arith.constant 0 : i32
    %c0_i32_0 = arith.constant 0 : i32
    %c0_i32_1 = arith.constant 0 : i32
    return %c0_i32, %c0_i32_0 : i32, i32
  }
  func.func @transform_5(%arg0: i32) -> (i32, i32) {
    %c0_i32 = arith.constant 0 : i32
    %c0_i32_0 = arith.constant 0 : i32
    %c0_i32_1 = arith.constant 0 : i32
    return %c0_i32, %c0_i32_0 : i32, i32
  }
  func.func @transform_6(%arg0: i32) -> (i32, i32) {
    %c0_i32 = arith.constant 0 : i32
    %c0_i32_0 = arith.constant 0 : i32
    %c0_i32_1 = arith.constant 0 : i32
    return %c0_i32, %c0_i32_0 : i32, i32
  }
  func.func @transform_7(%arg0: i32) -> (i32, i32) {
    %c0_i32 = arith.constant 0 : i32
    %c0_i32_0 = arith.constant 0 : i32
    %c0_i32_1 = arith.constant 0 : i32
    return %c0_i32, %c0_i32_0 : i32, i32
  }
}

</mosaic_0001>

<bundles_post_ra>
// kernel: tpu_custom_call.1
= control target key start
LH: loop header
LB: loop body
LE: loop exit
PB: predicated region body
PF: predicated region fallthrough
CT: control target
= control target key end

     0   :  { %vm43_vm0 = vcmask 392192   ;;  %vm269_vm1 = vcmask 261120   ;;  %s612_s2 = inlined_call_operand.vmem [shape: f32[48,128], index: 2, kind: input, shape index: {}]   ;;  %s613_s3 = inlined_call_operand.vmem [shape: f32[1,128], index: 3, kind: input, shape index: {}]   ;;  %s614_s4 = inlined_call_operand.vmem [shape: f32[1,128], index: 4, kind: input, shape index: {}]   ;;  %s615_s0 = inlined_call_operand.vmem [shape: f32[64,48], index: 0, kind: input, shape index: {}]   ;;  %s616_s5 = inlined_call_operand.vmem [shape: f32[1,128], index: 5, kind: input, shape index: {}]   ;;  %s617_s1 = inlined_call_operand.vmem [shape: f32[64,32], index: 1, kind: input, shape index: {}]   ;;  %s618_s6 = inlined_call_operand.vmem [shape: f32[64,32], index: 6, kind: output, shape index: {0}]   ;;  %s619_s7 = inlined_call_operand.vmem [shape: f32[64,32], index: 7, kind: output, shape index: {1}]  }
   0x1   :  { %v38_v0 = vld [vmem:[%s612_s2 + $0x28] sm:$0xff]  ;;  %v37_v1 = vld [vmem:[%s612_s2 + $0x20] sm:$0xff]  ;;  %v36_v2 = vld [vmem:[%s612_s2 + $0x18] sm:$0xff] }
   0x2   :  { %78 = vmatpush.msra.mxu0 %v38_v0  ;;  %302 = vmatpush.msra.mxu1 %v38_v0  ;;  %v35_v3 = vld [vmem:[%s612_s2 + $0x10] sm:$0xff]  ;;  %v34_v4 = vld [vmem:[%s612_s2 + $0x8] sm:$0xff]  ;;  %v33_v5 = vld [vmem:[%s612_s2] sm:$0xff] }
   0x3   :  { %303 = vmatpush.msra.mxu2 %v38_v0  ;;  %304 = vmatpush.msra.mxu3 %v38_v0  ;;  %v25_v6 = vld [vmem:[%s615_s0] sm:$0xff]  ;;  %v27_v7 = vld [vmem:[%s615_s0 + $0x10] sm:$0xff]  ;;  %v26_v10 = vld [vmem:[%s615_s0 + $0x8] sm:$0xff] }
   0x4   :  { %79 = vmatpush.msra.mxu0 %v37_v1  ;;  %305 = vmatpush.msra.mxu1 %v37_v1  ;;  %v29_v8 = vld [vmem:[%s615_s0 + $0x20] sm:$0xff]  ;;  %v31_v9 = vld [vmem:[%s615_s0 + $0x30] sm:$0xff]  ;;  %v28_v11 = vld [vmem:[%s615_s0 + $0x18] sm:$0xff] }
   0x5   :  { %306 = vmatpush.msra.mxu2 %v37_v1  ;;  %307 = vmatpush.msra.mxu3 %v37_v1  ;;  %v32_v12 = vld [vmem:[%s615_s0 + $0x38] sm:$0xff]  ;;  %v30_v13 = vld [vmem:[%s615_s0 + $0x28] sm:$0xff]  ;;  %v323_v14 = vld [vmem:[%s613_s3] ss:$0 sm:$0xff]  ;;  %s358_s3 = smov 64  }
   0x6   :  { %80 = vmatpush.msra.mxu0 %v36_v2  ;;  %308 = vmatpush.msra.mxu1 %v36_v2  ;;  %v324_v19 = vld [vmem:[%s614_s4] ss:$0 sm:$0xff]  ;;  %s359_s4 = smov 96  }
   0x7   :  { %309 = vmatpush.msra.mxu2 %v36_v2  ;;  %310 = vmatpush.msra.mxu3 %v36_v2  ;;  %v325_v22 = vld [vmem:[%s616_s5] ss:$0 sm:$0xff]  ;;  %s360_s5 = smov 32  }
   0x8   :  { %81 = vmatpush.msra.mxu0 %v35_v3  ;;  %311 = vmatpush.msra.mxu1 %v35_v3  ;;  %v181_v60 = vld [vmem:[%s617_s1] sm:$0xff] }
   0x9   :  { %312 = vmatpush.msra.mxu2 %v35_v3  ;;  %313 = vmatpush.msra.mxu3 %v35_v3  ;;  %v187_v3 = vld [vmem:[%s617_s1 + $0x30] sm:$0xff] }
   0xa   :  { %82 = vmatpush.msra.mxu0 %v34_v4  ;;  %314 = vmatpush.msra.mxu1 %v34_v4 }
   0xb   :  { %315 = vmatpush.msra.mxu2 %v34_v4  ;;  %316 = vmatpush.msra.mxu3 %v34_v4  ;;  %v183_v4 = vld [vmem:[%s617_s1 + $0x10] sm:$0xff] }
   0xc   :  { %83 = vmatpush.msra.mxu0 %v33_v5  ;;  %317 = vmatpush.msra.mxu1 %v33_v5 }
   0xd   :  { %294 = vmatmul.msk.f32.vlgmr.msra.gmra.mxu0 %vm43_vm0, %v25_v6  ;;  %296 = vmatmul.msk.f32.vlgmr.msra.gmra.mxu1 %vm43_vm0, %v27_v7 }
   0xe   :  { %318 = vmatpush.msra.mxu2 %v33_v5  ;;  %319 = vmatpush.msra.mxu3 %v33_v5 }
   0xf   :  { %298 = vmatmul.msk.f32.vlgmr.msra.gmra.mxu2 %vm43_vm0, %v29_v8  ;;  %300 = vmatmul.msk.f32.vlgmr.msra.gmra.mxu3 %vm43_vm0, %v31_v9 }
  0x15   :  { %295 = vmatmul.msk.f32.gmra.mxu0 %vm43_vm0, %v26_v10  ;;  %297 = vmatmul.msk.f32.gmra.mxu1 %vm43_vm0, %v28_v11 }
  0x17   :  { %301 = vmatmul.msk.f32.gmra.mxu3 %vm43_vm0, %v32_v12  ;;  %299 = vmatmul.msk.f32.gmra.mxu2 %vm43_vm0, %v30_v13 }
  0x8a   :  { %v85_v15 = vpop.f32.mrf.mxu0  ;;  %v91_v16 = vpop.f32.mrf.mxu1 }
  0x8b   :  { %v86_v17 = vadd.f32 %v323_v14, %v85_v15  ;;  %v92_v18 = vadd.f32 %v323_v14, %v91_v16 }
  0x8d   :  { %326 = vtanh.f32 %v86_v17 }
  0x8e   :  { %328 = vtanh.f32 %v92_v18 }
  0x92   :  { %v97_v20 = vpop.f32.mrf.mxu2  ;;  %v103_v21 = vpop.f32.mrf.mxu3 }
  0x93   :  { %v327_v23 = vpop.eup %326  ;;  %v98_v24 = vadd.f32 %v323_v14, %v97_v20  ;;  %v104_v25 = vadd.f32 %v323_v14, %v103_v21  ;;  %v94_v31 = vpop.f32.mrf.mxu1 }
  0x94   :  { %v329_v26 = vpop.eup %328  ;;  %v121_v27 = vmul.f32 %v327_v23, %v324_v19  ;;  %v88_v32 = vpop.f32.mrf.mxu0  ;;  %v95_v34 = vadd.f32 %v323_v14, %v94_v31  ;;  %v184_v23 = vld [vmem:[%s617_s1 + $0x18] sm:$0xff] }
  0x95   :  { %v123_v28 = vmul.f32 %v329_v26, %v324_v19  ;;  %330 = vtanh.f32 %v98_v24  ;;  %v89_v37 = vadd.f32 %v323_v14, %v88_v32  ;;  %v182_v32 = vld [vmem:[%s617_s1 + $0x8] sm:$0xff] }
  0x96   :  { %332 = vtanh.f32 %v104_v25  ;;  %v460_v29 = vadd.f32 %v325_v22, %v121_v27 }
  0x97   :  { %v462_v30 = vadd.f32 %v325_v22, %v123_v28  ;;  %334 = vtanh.f32 %v95_v34 }
  0x98   :  { %189 = vrot.lane.b32.xlu2 %v460_v29, %s358_s3  ;;  %149 = vrot.lane.b32.xlu0 %v460_v29, %s359_s4  ;;  %336 = vtanh.f32 %v89_v37 }
  0x99   :  { %153 = vrot.lane.b32.xlu1 %v462_v30, %s359_s4 }
  0x9a   :  { %v106_v41 = vpop.f32.mrf.mxu3  ;;  %v100_v46 = vpop.f32.mrf.mxu2 }
  0x9b   :  { %v331_v33 = vpop.eup %330  ;;  %v107_v42 = vadd.f32 %v323_v14, %v106_v41  ;;  %v101_v48 = vadd.f32 %v323_v14, %v100_v46  ;;  %v185_v14 = vld [vmem:[%s617_s1 + $0x20] sm:$0xff] }
  0x9c   :  { %v333_v35 = vpop.eup %332  ;;  %v125_v36 = vmul.f32 %v331_v33, %v324_v19 }
  0x9d   :  { %v127_v38 = vmul.f32 %v333_v35, %v324_v19  ;;  %v335_v43 = vpop.eup %334  ;;  %338 = vtanh.f32 %v107_v42 }
  0x9e   :  { %v470_v39 = vadd.f32 %v325_v22, %v125_v36  ;;  %v337_v44 = vpop.eup %336  ;;  %v124_v45 = vmul.f32 %v335_v43, %v324_v19  ;;  %340 = vtanh.f32 %v101_v48 }
  0x9f   :  { %v472_v40 = vadd.f32 %v325_v22, %v127_v38  ;;  %v122_v47 = vmul.f32 %v337_v44, %v324_v19  ;;  %v186_v38 = vld [vmem:[%s617_s1 + $0x28] sm:$0xff] }
  0xa0   :  { %157 = vrot.lane.b32.xlu2 %v470_v39, %s359_s4  ;;  %v485_v49 = vadd.f32 %v325_v22, %v124_v45 }
  0xa1   :  { %193 = vrot.lane.b32.xlu1 %v462_v30, %s358_s3  ;;  %161 = vrot.lane.b32.xlu0 %v472_v40, %s359_s4  ;;  %v487_v50 = vadd.f32 %v325_v22, %v122_v47 }
  0xa3   :  { %v339_v51 = vpop.eup %338 }
  0xa4   :  { %v128_v52 = vmul.f32 %v339_v51, %v324_v19  ;;  %v341_v53 = vpop.eup %340 }
  0xa5   :  { %v126_v55 = vmul.f32 %v341_v53, %v324_v19 }
  0xa6   :  { %v495_v54 = vadd.f32 %v325_v22, %v128_v52 }
  0xa7   :  { %v502_v56 = vadd.f32 %v325_v22, %v126_v55 }
  0xa8   :  { %201 = vrot.lane.b32.xlu2 %v472_v40, %s358_s3 }
  0xa9   :  { %237 = vrot.lane.b32.xlu1 %v460_v29, %s360_s5  ;;  %197 = vrot.lane.b32.xlu0 %v470_v39, %s358_s3 }
  0xb0   :  { %195 = vrot.lane.b32.xlu2 %v485_v49, %s358_s3 }
  0xb1   :  { %155 = vrot.lane.b32.xlu1 %v485_v49, %s359_s4  ;;  %151 = vrot.lane.b32.xlu0 %v487_v50, %s359_s4 }
  0xb8   :  { %239 = vrot.lane.b32.xlu2 %v487_v50, %s360_s5 }
  0xb9   :  { %163 = vrot.lane.b32.xlu1 %v495_v54, %s359_s4  ;;  %191 = vrot.lane.b32.xlu0 %v487_v50, %s358_s3 }
  0xc0   :  { %159 = vrot.lane.b32.xlu2 %v502_v56, %s359_s4 }
  0xc1   :  { %199 = vrot.lane.b32.xlu1 %v502_v56, %s358_s3  ;;  %203 = vrot.lane.b32.xlu0 %v495_v54, %s358_s3 }
  0xc8   :  { %245 = vrot.lane.b32.xlu2 %v470_v39, %s360_s5 }
  0xc9   :  { %243 = vrot.lane.b32.xlu1 %v485_v49, %s360_s5  ;;  %241 = vrot.lane.b32.xlu0 %v462_v30, %s360_s5 }
  0xd0   :  { %251 = vrot.lane.b32.xlu2 %v495_v54, %s360_s5 }
  0xd1   :  { %249 = vrot.lane.b32.xlu1 %v472_v40, %s360_s5  ;;  %247 = vrot.lane.b32.xlu0 %v502_v56, %s360_s5 }
  0xf2   :  { %v190_v57 = vpop.permute.xlu2 %189 }
  0xf3   :  { %v213_v63 = vmul.f32 %v190_v57, %v181_v60 }
  0xfa   :  { %v158_v58 = vpop.permute.xlu2 %157 }
  0xfb   :  { %v177_v18 = vmul.f32 %v158_v58, %v470_v39  ;;  %v188_v39 = vld [vmem:[%s617_s1 + $0x38] sm:$0xff] }
 0x102   :  { %v202_v59 = vpop.permute.xlu2 %201 }
 0x103   :  { %v219_v8 = vmul.f32 %v202_v59, %v187_v3 }
 0x10a   :  { %v196_v61 = vpop.permute.xlu2 %195  ;;  %v150_v62 = vpop.permute.xlu0 %149 }
 0x10b   :  { %v154_v0 = vpop.permute.xlu1 %153  ;;  %v173_v1 = vmul.f32 %v150_v62, %v460_v29  ;;  %v216_v26 = vmul.f32 %v196_v61, %v184_v23 }
 0x10c   :  { %v175_v9 = vmul.f32 %v154_v0, %v462_v30 }
 0x10d   :  { %v221_v2 = vadd.f32 %v213_v63, %v173_v1 }
 0x10f   :  { %270 = vst.msk [vmem:[%s618_s6] sm:$0xff] %vm269_vm1, %v221_v2  ;;  %342 = vtanh.f32 %v221_v2 }
 0x112   :  { %v240_v5 = vpop.permute.xlu2 %239 }
 0x113   :  { %v194_v6 = vpop.permute.xlu1 %193  ;;  %v162_v7 = vpop.permute.xlu0 %161 }
 0x114   :  { %v215_v10 = vmul.f32 %v194_v6, %v183_v4  ;;  %v179_v11 = vmul.f32 %v162_v7, %v472_v40 }
 0x115   :  { %v343_v15 = vpop.eup %342 }
 0x116   :  { %v223_v12 = vadd.f32 %v215_v10, %v175_v9  ;;  %v227_v13 = vadd.f32 %v219_v8, %v179_v11 }
 0x118   :  { %272 = vst.msk [vmem:[%s618_s6 + $0x10] sm:$0xff] %vm269_vm1, %v223_v12 }
 0x119   :  { %276 = vst.msk [vmem:[%s618_s6 + $0x30] sm:$0xff] %vm269_vm1, %v227_v13 }
 0x11a   :  { %v160_v20 = vpop.permute.xlu2 %159 }
 0x11b   :  { %v238_v16 = vpop.permute.xlu1 %237  ;;  %v198_v17 = vpop.permute.xlu0 %197  ;;  %v178_v42 = vmul.f32 %v160_v20, %v502_v56 }
 0x11c   :  { %v261_v19 = vmul.f32 %v343_v15, %v238_v16  ;;  %v217_v21 = vmul.f32 %v198_v17, %v185_v14 }
 0x11e   :  { %278 = vst.msk [vmem:[%s619_s7] sm:$0xff] %vm269_vm1, %v261_v19  ;;  %v225_v22 = vadd.f32 %v217_v21, %v177_v18 }
 0x120   :  { %344 = vtanh.f32 %v225_v22  ;;  %274 = vst.msk [vmem:[%s618_s6 + $0x20] sm:$0xff] %vm269_vm1, %v225_v22 }
 0x122   :  { %v246_v30 = vpop.permute.xlu2 %245 }
 0x123   :  { %v156_v24 = vpop.permute.xlu1 %155  ;;  %v152_v25 = vpop.permute.xlu0 %151 }
 0x124   :  { %v176_v27 = vmul.f32 %v156_v24, %v485_v49  ;;  %v174_v35 = vmul.f32 %v152_v25, %v487_v50 }
 0x126   :  { %v345_v28 = vpop.eup %344  ;;  %v224_v29 = vadd.f32 %v216_v26, %v176_v27 }
 0x127   :  { %v265_v31 = vmul.f32 %v345_v28, %v246_v30 }
 0x128   :  { %273 = vst.msk [vmem:[%s618_s6 + $0x18] sm:$0xff] %vm269_vm1, %v224_v29 }
 0x129   :  { %282 = vst.msk [vmem:[%s619_s7 + $0x20] sm:$0xff] %vm269_vm1, %v265_v31 }
 0x12a   :  { %v252_v57 = vpop.permute.xlu2 %251 }
 0x12b   :  { %v164_v33 = vpop.permute.xlu1 %163  ;;  %v192_v34 = vpop.permute.xlu0 %191 }
 0x12c   :  { %v214_v36 = vmul.f32 %v192_v34, %v182_v32  ;;  %v180_v43 = vmul.f32 %v164_v33, %v495_v54 }
 0x12e   :  { %v222_v37 = vadd.f32 %v214_v36, %v174_v35 }
 0x130   :  { %346 = vtanh.f32 %v222_v37  ;;  %271 = vst.msk [vmem:[%s618_s6 + $0x8] sm:$0xff] %vm269_vm1, %v222_v37 }
 0x131   :  { %348 = vtanh.f32 %v223_v12 }
 0x132   :  { %350 = vtanh.f32 %v224_v29 }
 0x133   :  { %v200_v40 = vpop.permute.xlu1 %199  ;;  %v204_v41 = vpop.permute.xlu0 %203 }
 0x134   :  { %v218_v44 = vmul.f32 %v200_v40, %v186_v38  ;;  %v220_v45 = vmul.f32 %v204_v41, %v188_v39 }
 0x136   :  { %v347_v46 = vpop.eup %346  ;;  %v226_v47 = vadd.f32 %v218_v44, %v178_v42  ;;  %v228_v48 = vadd.f32 %v220_v45, %v180_v43 }
 0x137   :  { %v262_v49 = vmul.f32 %v347_v46, %v240_v5  ;;  %v349_v50 = vpop.eup %348 }
 0x138   :  { %275 = vst.msk [vmem:[%s618_s6 + $0x28] sm:$0xff] %vm269_vm1, %v226_v47  ;;  %352 = vtanh.f32 %v228_v48  ;;  %v351_v51 = vpop.eup %350 }
 0x139   :  { %279 = vst.msk [vmem:[%s619_s7 + $0x8] sm:$0xff] %vm269_vm1, %v262_v49  ;;  %354 = vtanh.f32 %v227_v13 }
 0x13a   :  { %277 = vst.msk [vmem:[%s618_s6 + $0x38] sm:$0xff] %vm269_vm1, %v228_v48  ;;  %356 = vtanh.f32 %v226_v47 }
 0x13b   :  { %v244_v52 = vpop.permute.xlu1 %243  ;;  %v242_v53 = vpop.permute.xlu0 %241 }
 0x13c   :  { %v264_v54 = vmul.f32 %v351_v51, %v244_v52  ;;  %v263_v55 = vmul.f32 %v349_v50, %v242_v53 }
 0x13e   :  { %281 = vst.msk [vmem:[%s619_s7 + $0x18] sm:$0xff] %vm269_vm1, %v264_v54  ;;  %v353_v56 = vpop.eup %352 }
 0x13f   :  { %280 = vst.msk [vmem:[%s619_s7 + $0x10] sm:$0xff] %vm269_vm1, %v263_v55  ;;  %v268_v58 = vmul.f32 %v353_v56, %v252_v57  ;;  %v355_v59 = vpop.eup %354 }
 0x140   :  { %v357_v60 = vpop.eup %356 }
 0x141   :  { %285 = vst.msk [vmem:[%s619_s7 + $0x38] sm:$0xff] %vm269_vm1, %v268_v58 }
 0x143   :  { %v250_v61 = vpop.permute.xlu1 %249  ;;  %v248_v62 = vpop.permute.xlu0 %247 }
 0x144   :  { %v267_v63 = vmul.f32 %v355_v59, %v250_v61  ;;  %v266_v0 = vmul.f32 %v357_v60, %v248_v62 }
 0x146   :  { %284 = vst.msk [vmem:[%s619_s7 + $0x30] sm:$0xff] %vm269_vm1, %v267_v63 }
 0x147   :  { %283 = vst.msk [vmem:[%s619_s7 + $0x28] sm:$0xff] %vm269_vm1, %v266_v0 }

</bundles_post_ra>
